<compile_context>
chip_gen: v6e
topology: v6e:2x2x1
jax: 0.10.0
libtpu: 0.0.40
codegen_flags: <defaults>
</compile_context>

<pallas_src>
import functools

import jax
import jax.numpy as jnp
from jax.experimental import pallas as pl
from jax.experimental.pallas import tpu as pltpu

_EPS = 1e-12  # torch.nn.functional.normalize default eps


def _row_tile(n, want, align):
    """Tile size for a row axis: multiple of `align` and <= n, or n itself if n < align."""
    if n < align:
        return n                       # full-dim block: always legal
    return max(align, min(want, (n // align) * align))


# --------------------------------------------------------------------------
# Fused pairwise-distance kernel: one (tq, tr) output tile per grid step.
#   normalized=True : qs/rs hold 1/max(||row||, eps); sq = 2 - 2*(q.r)*qs*rs
#   normalized=False: qs/rs hold ||row||^2;           sq = qs + rs - 2*(q.r)
# --------------------------------------------------------------------------
def _finalize(sq, power):
    if power == 2:          # sqrt-then-square is wasted EUP work
        return sq
    mat = jnp.sqrt(sq)
    if power != 1:
        mat = mat ** power
    return mat


def _dist_kernel(qs_ref, rs_ref, q_ref, r_ref, o_ref, *, power, normalized):
    dots = jax.lax.dot_general(
        q_ref[...], r_ref[...],
        dimension_numbers=(((1,), (1,)), ((), ())),
        preferred_element_type=jnp.float32)                   # (tq, tr), f32 accum
    if normalized:
        # ||q/||q|| - r/||r||||^2 = 2 - 2 (q.r) * qinv * rinv
        sq = jnp.maximum(2.0 - 2.0 * dots * (qs_ref[...] * rs_ref[...]), 0.0)
    else:
        sq = jnp.maximum(qs_ref[...] + rs_ref[...] - 2.0 * dots, 0.0)
    o_ref[...] = _finalize(sq, power).astype(o_ref.dtype)


# --------------------------------------------------------------------------
# BaseDistance.forward
# --------------------------------------------------------------------------
def base_distance_forward(query_emb, ref_emb=None, *, normalize_embeddings=True,
                          p=2, power=1, use_bf16_matmul=True,
                          tq=512, tr=256, vmem_limit_bytes=48 * 1024 * 1024):
    """Pallas implementation of BaseDistance.forward (LpDistance p=2 concretization).

    use_bf16_matmul=True (default) streams bf16 embedding tiles into the MXU with
    f32 accumulation; set False when very small distances must be resolved.
    """
    assert p == 2, "only p=2 (L2 pairwise distance) is implemented"
    Q, D = query_emb.shape
    ref_same = ref_emb is None
    if ref_same:
        ref_emb = query_emb
    R, Dr = ref_emb.shape
    assert D == Dr

    mm_dtype = jnp.bfloat16 if use_bf16_matmul else jnp.float32
    row_align = 16 if use_bf16_matmul else 8      # bf16 packs 2 rows per sublane

    # Per-row statistics (cheap jnp reductions; XLA fuses them with the bf16 cast
    # so each embedding matrix is read once here -- no full normalized copy is
    # ever written back to HBM).
    qf = query_emb.astype(jnp.float32)
    qq = jnp.sum(qf * qf, axis=1, keepdims=True)                     # (Q, 1)
    if ref_same:
        rr_col = qq
    else:
        rf = ref_emb.astype(jnp.float32)
        rr_col = jnp.sum(rf * rf, axis=1, keepdims=True)             # (R, 1)

    if normalize_embeddings:
        # 1 / max(||x||, eps)  ==  rsqrt(max(sumsq, eps^2))
        qs = jax.lax.rsqrt(jnp.maximum(qq, _EPS * _EPS))             # (Q, 1)
        rs = jax.lax.rsqrt(jnp.maximum(rr_col, _EPS * _EPS)).T       # (1, R)
    else:
        qs = qq                                                      # (Q, 1)
        rs = rr_col.T                                                # (1, R)

    q_mm = query_emb.astype(mm_dtype)
    r_mm = q_mm if ref_same else ref_emb.astype(mm_dtype)

    # Tile sizes: tq multiple of 16 (bf16) / 8 (f32); tr lane-dense (mult of 128)
    # unless R < 128, in which case the full dim is used.  No padding of the big
    # matrices: ragged edge blocks are masked by Pallas on writeback.
    tq_eff = _row_tile(Q, tq, row_align)
    tr_eff = _row_tile(R, tr, 128)
    grid = (pl.cdiv(Q, tq_eff), pl.cdiv(R, tr_eff))   # ref tiles innermost

    itemsize = jnp.dtype(mm_dtype).itemsize
    cost = pl.CostEstimate(
        flops=2 * Q * R * D + 4 * Q * R,
        transcendentals=0 if power == 2 else Q * R,           # sqrt path
        bytes_accessed=(Q * D * itemsize                       # q streamed once
                        + grid[0] * R * D * itemsize           # r re-streamed per q tile
                        + Q * R * 4                            # f32 output
                        + 4 * (Q + R)))                        # per-row stats

    kernel = functools.partial(_dist_kernel, power=power,
                               normalized=normalize_embeddings)

    q_spec = pl.BlockSpec((tq_eff, D), lambda i, j: (i, 0))
    r_spec = pl.BlockSpec((tr_eff, D), lambda i, j: (j, 0))
    qs_spec = pl.BlockSpec((tq_eff, 1), lambda i, j: (i, 0))
    rs_spec = pl.BlockSpec((1, tr_eff), lambda i, j: (0, j))
    o_spec = pl.BlockSpec((tq_eff, tr_eff), lambda i, j: (i, j))

    mat = pl.pallas_call(
        kernel,
        out_shape=jax.ShapeDtypeStruct((Q, R), jnp.float32),
        grid_spec=pltpu.PrefetchScalarGridSpec(
            num_scalar_prefetch=0,
            grid=grid,
            in_specs=[qs_spec, rs_spec, q_spec, r_spec],
            out_specs=o_spec),
        compiler_params=pltpu.CompilerParams(
            dimension_semantics=("parallel", "parallel"),
            vmem_limit_bytes=vmem_limit_bytes),
        cost_estimate=cost,
    )(qs, rs, q_mm, r_mm)

    assert mat.shape == (Q, R)
    return mat


# --------------------------------------------------------------------------
# Pure-JAX reference
# --------------------------------------------------------------------------
def _reference(query_emb, ref_emb, normalize_embeddings=True, power=1):
    def norm(x):
        n = jnp.sqrt(jnp.sum(x * x, axis=1, keepdims=True))
        return x / jnp.maximum(n, _EPS)
    q = norm(query_emb) if normalize_embeddings else query_emb
    r = norm(ref_emb) if normalize_embeddings else ref_emb
    sq = jnp.maximum(
        jnp.sum(q * q, 1)[:, None] + jnp.sum(r * r, 1)[None, :] - 2.0 * q @ r.T, 0.0)
    d = jnp.sqrt(sq)
    return d ** power if power != 1 else d


if __name__ == "__main__":
    key = jax.random.PRNGKey(0)
    kq, kr, kq2, kr2 = jax.random.split(key, 4)
    Q, R, D = 16, 8, 32
    query = jax.random.normal(kq, (Q, D), dtype=jnp.float32)
    ref = jax.random.normal(kr, (R, D), dtype=jnp.float32)

    # 1) default path: bf16 MXU, fused normalization, ref provided, power=1
    mat = base_distance_forward(query, ref, normalize_embeddings=True, p=2, power=1)
    jax.block_until_ready(mat)
    assert mat.shape == (Q, R)
    assert jnp.allclose(mat, _reference(query, ref, True, 1), atol=2e-2, rtol=2e-2)

    # 2) ref_emb=None (query vs itself), power=2 (sqrt skipped in kernel), bf16 default
    mat_self = base_distance_forward(query, None, normalize_embeddings=True, p=2, power=2)
    jax.block_until_ready(mat_self)
    assert mat_self.shape == (Q, Q)
    assert jnp.allclose(mat_self, _reference(query, query, True, 2), atol=2e-2, rtol=2e-2)

    # 3) unnormalized path, full f32 (tight tolerance)
    mat_raw = base_distance_forward(query, ref, normalize_embeddings=False, p=2, power=1,
                                    use_bf16_matmul=False)
    jax.block_until_ready(mat_raw)
    assert jnp.allclose(mat_raw, _reference(query, ref, False, 1), atol=1e-4, rtol=1e-4)

    # 4) normalized path, full f32 (tight tolerance)
    mat_f32 = base_distance_forward(query, ref, normalize_embeddings=True, p=2, power=1,
                                    use_bf16_matmul=False)
    jax.block_until_ready(mat_f32)
    assert jnp.allclose(mat_f32, _reference(query, ref, True, 1), atol=1e-4, rtol=1e-4)

    # 5) ragged shapes (non-multiples of the tile sizes) -> exercises masked edge blocks
    Q2, R2, D2 = 37, 19, 48
    query2 = jax.random.normal(kq2, (Q2, D2), dtype=jnp.float32)
    ref2 = jax.random.normal(kr2, (R2, D2), dtype=jnp.float32)
    mat_rag = base_distance_forward(query2, ref2, normalize_embeddings=True, p=2, power=1,
                                    use_bf16_matmul=False)
    jax.block_until_ready(mat_rag)
    assert mat_rag.shape == (Q2, R2)
    assert jnp.allclose(mat_rag, _reference(query2, ref2, True, 1), atol=1e-4, rtol=1e-4)
    mat_rag_bf16 = base_distance_forward(query2, ref2, normalize_embeddings=True, p=2, power=1)
    jax.block_until_ready(mat_rag_bf16)
    assert jnp.allclose(mat_rag_bf16, _reference(query2, ref2, True, 1), atol=2e-2, rtol=2e-2)

    print("KERNEL_OK")
</pallas_src>

<mosaic_0001>
module attributes {stable_mosaic.version = 11 : i64} {
  func.func @_dist_kernel(%arg0: i32, %arg1: i32, %arg2: memref<16x1xf32, #tpu.memory_space<vmem>>, %arg3: memref<1x8xf32, #tpu.memory_space<vmem>>, %arg4: memref<16x32xbf16, #tpu.memory_space<vmem>>, %arg5: memref<8x32xbf16, #tpu.memory_space<vmem>>, %arg6: memref<16x8xf32, #tpu.memory_space<vmem>>) attributes {dimension_semantics = [#tpu.dimension_semantics<parallel>, #tpu.dimension_semantics<parallel>], iteration_bounds = array<i64: 1, 1>, scalar_prefetch = 0 : i64, scratch_operands = 0 : i64, tpu.core_type = #tpu.core_type<tc>, window_params = [{transform_indices = @transform_0, window_bounds = array<i64: 16, 1>}, {transform_indices = @transform_1, window_bounds = array<i64: 1, 8>}, {transform_indices = @transform_2, window_bounds = array<i64: 16, 32>}, {transform_indices = @transform_3, window_bounds = array<i64: 8, 32>}, {transform_indices = @transform_4, window_bounds = array<i64: 16, 8>}]} {
    %c0 = arith.constant 0 : index
    %c0_0 = arith.constant 0 : index
    %0 = vector.load %arg4[%c0, %c0_0] : memref<16x32xbf16, #tpu.memory_space<vmem>>, vector<16x32xbf16>
    %c0_1 = arith.constant 0 : index
    %c0_2 = arith.constant 0 : index
    %1 = vector.load %arg5[%c0_1, %c0_2] : memref<8x32xbf16, #tpu.memory_space<vmem>>, vector<8x32xbf16>
    %cst = arith.constant dense<0.000000e+00> : vector<16x8xf32>
    %2 = tpu.matmul %0, %1, %cst {dimension_numbers = #tpu.dot_dimension_numbers<[1], [1], [0], [0], [0, 0, 1, 0], [], []>} : vector<16x32xbf16>, vector<8x32xbf16>, vector<16x8xf32> -> vector<16x8xf32>
    %cst_3 = arith.constant 2.000000e+00 : f32
    %3 = vector.broadcast %cst_3 : f32 to vector<16x8xf32>
    %4 = arith.mulf %3, %2 : vector<16x8xf32>
    %c0_4 = arith.constant 0 : index
    %c0_5 = arith.constant 0 : index
    %5 = vector.load %arg2[%c0_4, %c0_5] : memref<16x1xf32, #tpu.memory_space<vmem>>, vector<16x1xf32>
    %c0_6 = arith.constant 0 : index
    %c0_7 = arith.constant 0 : index
    %6 = vector.load %arg3[%c0_6, %c0_7] : memref<1x8xf32, #tpu.memory_space<vmem>>, vector<1x8xf32>
    %7 = vector.broadcast %5 : vector<16x1xf32> to vector<16x8xf32>
    %8 = vector.broadcast %6 : vector<1x8xf32> to vector<16x8xf32>
    %9 = arith.mulf %7, %8 : vector<16x8xf32>
    %10 = arith.mulf %4, %9 : vector<16x8xf32>
    %cst_8 = arith.constant 2.000000e+00 : f32
    %11 = vector.broadcast %cst_8 : f32 to vector<16x8xf32>
    %12 = arith.subf %11, %10 : vector<16x8xf32>
    %cst_9 = arith.constant 0.000000e+00 : f32
    %13 = vector.broadcast %cst_9 : f32 to vector<16x8xf32>
    %14 = arith.maximumf %12, %13 : vector<16x8xf32>
    %15 = math.sqrt %14 : vector<16x8xf32>
    %c0_10 = arith.constant 0 : index
    %c0_11 = arith.constant 0 : index
    %16 = vector.load %arg6[%c0_10, %c0_11] : memref<16x8xf32, #tpu.memory_space<vmem>>, vector<16x8xf32>
    tpu.vector_store %arg6[%c0_10, %c0_11], %15 {strides = array<i32>} : memref<16x8xf32, #tpu.memory_space<vmem>>, vector<16x8xf32>,
    return
  }
  func.func @transform_0(%arg0: i32, %arg1: i32) -> (i32, i32) {
    %c0_i32 = arith.constant 0 : i32
    %c0_i32_0 = arith.constant 0 : i32
    return %arg0, %c0_i32 : i32, i32
  }
  func.func @transform_1(%arg0: i32, %arg1: i32) -> (i32, i32) {
    %c0_i32 = arith.constant 0 : i32
    %c0_i32_0 = arith.constant 0 : i32
    return %c0_i32, %arg1 : i32, i32
  }
  func.func @transform_2(%arg0: i32, %arg1: i32) -> (i32, i32) {
    %c0_i32 = arith.constant 0 : i32
    %c0_i32_0 = arith.constant 0 : i32
    return %arg0, %c0_i32 : i32, i32
  }
  func.func @transform_3(%arg0: i32, %arg1: i32) -> (i32, i32) {
    %c0_i32 = arith.constant 0 : i32
    %c0_i32_0 = arith.constant 0 : i32
    return %arg1, %c0_i32 : i32, i32
  }
  func.func @transform_4(%arg0: i32, %arg1: i32) -> (i32, i32) {
    %c0_i32 = arith.constant 0 : i32
    return %arg0, %arg1 : i32, i32
  }
}

</mosaic_0001>

<bundles_post_ra>
// kernel: tpu_custom_call.1
= control target key start
LH: loop header
LB: loop body
LE: loop exit
PB: predicated region body
PF: predicated region fallthrough
CT: control target
= control target key end

     0   :  { %vm26_vm0 = vcmask 261120   ;;  %v144_v0 = vmov 0.0   ;;  %vm145_vm1 = vmmov 0   ;;  %v146_v3 = vmov 0   ;;  %s195_s3 = inlined_call_operand.vmem [shape: bf16[8,32], index: 3, kind: input, shape index: {}]   ;;  %s196_s2 = inlined_call_operand.vmem [shape: bf16[16,32], index: 2, kind: input, shape index: {}]   ;;  %s197_s0 = inlined_call_operand.vmem [shape: f32[16,1], index: 0, kind: input, shape index: {}]   ;;  %s198_s1 = inlined_call_operand.vmem [shape: f32[1,8], index: 1, kind: input, shape index: {}]   ;;  %s199_s4 = inlined_call_operand.vmem [shape: f32[16,8], index: 4, kind: output, shape index: {}]  }
   0x1   :  { %129 = vmatprep.subr.bf16.mxu0 %v144_v0  ;;  %v20_v1 = vld [vmem:[%s195_s3] sm:$0xf]  ;;  %131 = vmatprep.mubr.msk.bf16.mxu0 %vm145_vm1, %v144_v0  ;;  %v77_v5 = vld [vmem:[%s197_s0 + $0x8] sm:$0xff]  ;;  %vm117_vm3 = vcmask 64512  }
   0x2   :  { %v31_v2 = vsel %vm26_vm0, %v20_v1, 0  ;;  %138 = vset.pattern.permute.xlu0 %v146_v3  ;;  %v76_v4 = vld [vmem:[%s197_s0] sm:$0xff] }
   0x3   :  { %130 = vmatpush3.bf16.xpose.msra.mxu0 %v31_v2  ;;  %81 = vperm.xlu0 %138, %v76_v4   ;;  %v139_v6 = vld [vmem:[%s196_s2] sm:$0xff]  }
   0x4   :  { %v126_v7 = vld [vmem:[%s198_s1] ss:$0 sm:$0xff] }
   0x7   :  { %86 = vperm.xlu0 %138, %v77_v5  }
   0xa   :  { %132 = vmatmul.mubr.msk.bf16.vlgmr.msra.gmra.mxu0 %vm26_vm0, %v139_v6 }
  0x7e   :  { %v82_v8 = vpop.permute.xlu0 %81 }
  0x7f   :  { %v95_v9 = vmul.f32 %v126_v7, %v82_v8 }
  0x82   :  { %v87_v12 = vpop.permute.xlu0 %86 }
  0x83   :  { %v96_v17 = vmul.f32 %v126_v7, %v87_v12 }
  0xca   :  { %v67_v10 = vpop.f32.mrf.mxu0 }
  0xcb   :  { %v74_v11 = vmul.f32 2.0, %v67_v10 }
  0xcc   :  { %v133_v13 = vpop.f32.mrf.mxu0 }
  0xcd   :  { %v97_v14 = vmul.f32 %v95_v9, %v74_v11 }
  0xce   :  { %v70_v15 = vpop.f32.mrf.mxu0 }
  0xcf   :  { %v99_v16 = vsub.f32 2.0, %v97_v14  ;;  %v75_v18 = vmul.f32 2.0, %v70_v15 }
  0xd0   :  { %v134_v19 = vpop.f32.mrf.mxu0 }
  0xd1   :  { %v101_v20 = vmax.f32 %v99_v16, 0.0  ;;  %v98_v21 = vmul.f32 %v96_v17, %v75_v18 }
  0xd3   :  { %140 = vrsqrt.f32 %v101_v20  ;;  %v100_v22 = vsub.f32 2.0, %v98_v21  ;;  %vm105_vm2 = vcmp.eq.f32.partialorder %v101_v20, inf  ;;  %v108_v26 = vand.u32 2147483648, %v101_v20 }
  0xd4   :  { %vm107_vm4 = vcmp.eq.f32.partialorder %v101_v20, 0.0 }
  0xd5   :  { %v102_v23 = vmax.f32 %v100_v22, 0.0 }
  0xd7   :  { %142 = vrsqrt.f32 %v102_v23  ;;  %vm112_vm5 = vcmp.eq.f32.partialorder %v102_v23, inf  ;;  %v115_v31 = vand.u32 2147483648, %v102_v23  ;;  %vm114_vm6 = vcmp.eq.f32.partialorder %v102_v23, 0.0 }
  0xe0   :  { %v141_v24 = vpop.eup %140 }
  0xe1   :  { %v104_v25 = vmul.f32 %v141_v24, %v101_v20 }
  0xe3   :  { %v106_v27 = vsel %vm105_vm2, %v101_v20, %v104_v25 }
  0xe4   :  { %v109_v28 = vsel %vm107_vm4, %v108_v26, %v106_v27  ;;  %v143_v29 = vpop.eup %142 }
  0xe5   :  { %118 = vst.msk [vmem:[%s199_s4] sm:$0xff] %vm117_vm3, %v109_v28  ;;  %v111_v30 = vmul.f32 %v143_v29, %v102_v23 }
  0xe7   :  { %v113_v32 = vsel %vm112_vm5, %v102_v23, %v111_v30 }
  0xe8   :  { %v116_v33 = vsel %vm114_vm6, %v115_v31, %v113_v32 }
  0xe9   :  { %119 = vst.msk [vmem:[%s199_s4 + $0x8] sm:$0xff] %vm117_vm3, %v116_v33 }

</bundles_post_ra>
